<compile_context>
chip_gen: v6e
topology: v6e:2x2x1
jax: 0.10.0
libtpu: 0.0.40
codegen_flags: <defaults>
</compile_context>

<pallas_src>
import functools

import jax
import jax.numpy as jnp
from jax.experimental import pallas as pl
from jax.experimental.pallas import tpu as pltpu


# ----------------------------------------------------------------------------
# Fused kernel: (1x1 conv as matmul) + bias + LayerNorm + GELU
# ----------------------------------------------------------------------------
def _fcu_down_kernel(xp_ref, w_ref, p_ref, o_ref, *, eps):
    # xp_ref : (C_in, TM)   pooled input, tokens on the lane dim
    # w_ref  : (C_in, C_out)
    # p_ref  : (3, C_out)   packed [conv_bias; ln_gamma; ln_beta]
    # o_ref  : (TM, C_out)  lane-dense output tile (row-0 aligned, no cls row)
    x = xp_ref[...]
    w = w_ref[...]

    # y[t, o] = sum_c x[c, t] * w[c, o]  — contraction over LHS dim 0 keeps the
    # result (TM, C_out) lane-dense without any wrapper-side transpose of xp.
    y = jax.lax.dot_general(
        x, w,
        dimension_numbers=(((0,), (0,)), ((), ())),
        preferred_element_type=jnp.float32,
    )                                                   # (TM, C_out) f32

    p = p_ref[...].astype(jnp.float32)                  # (3, C_out)
    y = y + p[0:1, :]                                    # conv bias

    # LayerNorm over channels (lane dimension), eps = 1e-6
    mean = jnp.mean(y, axis=-1, keepdims=True)
    yc = y - mean
    var = jnp.mean(yc * yc, axis=-1, keepdims=True)
    y = yc * jax.lax.rsqrt(var + eps)
    y = y * p[1:2, :] + p[2:3, :]                        # gamma, beta

    # GELU (tanh approximation).
    # TODO(synk): PyTorch nn.GELU default is the exact erf form; erf has no
    # guaranteed Mosaic lowering, so the standard tanh approximation is used
    # (max abs error ~1e-3).
    c = 0.7978845608028654  # sqrt(2/pi)
    y = 0.5 * y * (1.0 + jnp.tanh(c * (y + 0.044715 * (y * y * y))))

    o_ref[...] = y.astype(o_ref.dtype)


# ----------------------------------------------------------------------------
# Parameter preparation (done ONCE, not per forward)
# ----------------------------------------------------------------------------
def prepare_params(pt_params):
    """Convert PyTorch-layout FCUDown parameters to kernel layout."""
    w = pt_params["conv_weight"]                         # (C_out, C_in, 1, 1)
    c_out, c_in = w.shape[0], w.shape[1]
    ln_params = jnp.stack(
        [
            pt_params["conv_bias"].reshape(c_out),
            pt_params["ln_gamma"].reshape(c_out),
            pt_params["ln_beta"].reshape(c_out),
        ],
        axis=0,
    )                                                    # (3, C_out) packed
    return {
        "conv_w": w.reshape(c_out, c_in).T,              # (C_in, C_out)
        "ln_params": ln_params,
    }


def _pick_token_tile(np_tokens, target=512):
    """Token tile size. Full extent if small (always layout-legal); otherwise a
    multiple of 128 (lane-dense xp block, 8-aligned output rows)."""
    if np_tokens <= target:
        return np_tokens
    return max((target // 128) * 128, 128)


# ----------------------------------------------------------------------------
# Forward
# ----------------------------------------------------------------------------
def fcu_down_forward(x, x_t, kparams, dw_stride, eps=1e-6):
    B, C_in, H, W = x.shape
    C_out = kparams["conv_w"].shape[1]
    Hp, Wp = H // dw_stride, W // dw_stride
    Np = Hp * Wp

    # AvgPool first (commutes with the 1x1 conv): dw_stride^2 data reduction
    # before the fused kernel. Keep channels-first so tokens (Np) stay in the
    # lane dim — no HBM transpose pass.
    xp = x.reshape(B, C_in, Hp, dw_stride, Wp, dw_stride).mean(axis=(3, 5))
    xp = xp.reshape(B, C_in, Np)                         # (B, C_in, Np)

    TM = _pick_token_tile(Np)
    NT = pl.cdiv(Np, TM)

    itemsize = x.dtype.itemsize
    cost = pl.CostEstimate(
        flops=2 * B * Np * C_in * C_out,
        transcendentals=B * Np * C_out,                  # tanh per output element
        bytes_accessed=(B * Np * C_in * itemsize
                        + C_in * C_out * kparams["conv_w"].dtype.itemsize
                        + 3 * C_out * kparams["ln_params"].dtype.itemsize
                        + B * Np * C_out * itemsize),
    )

    kernel = functools.partial(_fcu_down_kernel, eps=eps)
    y = pl.pallas_call(
        kernel,
        out_shape=jax.ShapeDtypeStruct((B, Np, C_out), x.dtype),
        grid=(B, NT),
        in_specs=[
            pl.BlockSpec((None, C_in, TM), lambda b, t: (b, 0, t)),   # pooled x
            pl.BlockSpec((C_in, C_out), lambda b, t: (0, 0)),         # conv weight
            pl.BlockSpec((3, C_out), lambda b, t: (0, 0)),            # packed params
        ],
        out_specs=pl.BlockSpec((None, TM, C_out), lambda b, t: (b, t, 0)),
        compiler_params=pltpu.CompilerParams(
            dimension_semantics=("parallel", "parallel")),
        cost_estimate=cost,
    )(xp, kparams["conv_w"], kparams["ln_params"])

    # cls row handled OUTSIDE the kernel: kernel stores stay aligned/unmasked,
    # and the cls token is never round-tripped through a cast.
    return jnp.concatenate([x_t[:, :1, :], y], axis=1)   # (B, 1 + Np, C_out)


# ----------------------------------------------------------------------------
# Pure-JAX reference (mirrors the PyTorch module, for verification only)
# ----------------------------------------------------------------------------
def fcu_down_reference(x, x_t, pt_params, dw_stride, eps=1e-6, approximate_gelu=True):
    B, C_in, H, W = x.shape
    wc = pt_params["conv_weight"].reshape(pt_params["conv_weight"].shape[0], C_in)
    bc = pt_params["conv_bias"]
    # conv_project (1x1 conv), then avg pool, then flatten(2).transpose(1,2)
    y = jnp.einsum("oc,bchw->bohw", wc, x) + bc[None, :, None, None]
    Hp, Wp = H // dw_stride, W // dw_stride
    y = y.reshape(B, -1, Hp, dw_stride, Wp, dw_stride).mean(axis=(3, 5))
    y = y.reshape(B, -1, Hp * Wp).transpose(0, 2, 1)     # (B, Np, C_out)
    # LayerNorm(eps=1e-6)
    mean = y.mean(-1, keepdims=True)
    var = ((y - mean) ** 2).mean(-1, keepdims=True)
    y = (y - mean) / jnp.sqrt(var + eps)
    y = y * pt_params["ln_gamma"] + pt_params["ln_beta"]
    # GELU
    y = jax.nn.gelu(y, approximate=approximate_gelu)
    # prepend cls token
    return jnp.concatenate([x_t[:, :1, :], y], axis=1)


# ----------------------------------------------------------------------------
# Main
# ----------------------------------------------------------------------------
if __name__ == "__main__":
    B, C_in, H, W = 2, 8, 16, 16
    C_out = 128
    dw_stride = 4
    Np = (H // dw_stride) * (W // dw_stride)

    key = jax.random.PRNGKey(0)
    kx, kxt, kw, kb, kg, kbe = jax.random.split(key, 6)

    x = jax.random.normal(kx, (B, C_in, H, W), dtype=jnp.float32)
    x_t = jax.random.normal(kxt, (B, Np + 1, C_out), dtype=jnp.float32)

    pt_params = {
        "conv_weight": jax.random.normal(kw, (C_out, C_in, 1, 1), jnp.float32) * 0.1,
        "conv_bias": jax.random.normal(kb, (C_out,), jnp.float32) * 0.1,
        "ln_gamma": 1.0 + 0.1 * jax.random.normal(kg, (C_out,), jnp.float32),
        "ln_beta": 0.1 * jax.random.normal(kbe, (C_out,), jnp.float32),
    }
    kparams = prepare_params(pt_params)   # one-time layout conversion

    fwd = jax.jit(fcu_down_forward, static_argnames=("dw_stride",))
    y = fwd(x, x_t, kparams, dw_stride=dw_stride)
    y = jax.block_until_ready(y)
    assert y.shape == (B, Np + 1, C_out), y.shape

    # Tight check against a reference using the same (tanh) GELU form.
    y_ref_tanh = fcu_down_reference(x, x_t, pt_params, dw_stride, approximate_gelu=True)
    assert jnp.allclose(y, y_ref_tanh, atol=1e-4, rtol=1e-3), "mismatch vs tanh-GELU reference"

    # Sanity check against the exact-erf GELU (PyTorch default) with a loose tol.
    y_ref_exact = fcu_down_reference(x, x_t, pt_params, dw_stride, approximate_gelu=False)
    assert jnp.allclose(y, y_ref_exact, atol=1e-2, rtol=1e-2), "mismatch vs exact-GELU reference"

    print("KERNEL_OK")
</pallas_src>

<mosaic_0001>
module attributes {stable_mosaic.version = 11 : i64} {
  func.func @_fcu_down_kernel(%arg0: i32, %arg1: i32, %arg2: memref<1x8x16xf32, #tpu.memory_space<vmem>>, %arg3: memref<8x128xf32, #tpu.memory_space<vmem>>, %arg4: memref<3x128xf32, #tpu.memory_space<vmem>>, %arg5: memref<1x16x128xf32, #tpu.memory_space<vmem>>) attributes {dimension_semantics = [#tpu.dimension_semantics<parallel>, #tpu.dimension_semantics<parallel>], iteration_bounds = array<i64: 2, 1>, scalar_prefetch = 0 : i64, scratch_operands = 0 : i64, tpu.core_type = #tpu.core_type<tc>, window_params = [{transform_indices = @transform_0, window_bounds = array<i64: 1, 8, 16>}, {pipeline_mode = #tpu.pipeline_mode<synchronous>, transform_indices = @transform_1, window_bounds = array<i64: 8, 128>}, {pipeline_mode = #tpu.pipeline_mode<synchronous>, transform_indices = @transform_2, window_bounds = array<i64: 3, 128>}, {transform_indices = @transform_3, window_bounds = array<i64: 1, 16, 128>}]} {
    %c0 = arith.constant 0 : index
    %c0_0 = arith.constant 0 : index
    %c0_1 = arith.constant 0 : index
    %0 = vector.load %arg2[%c0, %c0_0, %c0_1] : memref<1x8x16xf32, #tpu.memory_space<vmem>>, vector<1x8x16xf32>
    %1 = vector.shape_cast %0 : vector<1x8x16xf32> to vector<8x16xf32>
    %c0_2 = arith.constant 0 : index
    %c0_3 = arith.constant 0 : index
    %2 = vector.load %arg3[%c0_2, %c0_3] : memref<8x128xf32, #tpu.memory_space<vmem>>, vector<8x128xf32>
    %cst = arith.constant dense<0.000000e+00> : vector<16x128xf32>
    %3 = tpu.matmul %1, %2, %cst {dimension_numbers = #tpu.dot_dimension_numbers<[0], [0], [1], [1], [0, 1, 1, 1], [], []>} : vector<8x16xf32>, vector<8x128xf32>, vector<16x128xf32> -> vector<16x128xf32>
    %c0_4 = arith.constant 0 : index
    %c0_5 = arith.constant 0 : index
    %4 = vector.load %arg4[%c0_4, %c0_5] : memref<3x128xf32, #tpu.memory_space<vmem>>, vector<3x128xf32>
    %5 = vector.extract_strided_slice %4 {offsets = [0, 0], sizes = [1, 128], strides = [1, 1]} : vector<3x128xf32> to vector<1x128xf32>
    %6 = vector.broadcast %5 : vector<1x128xf32> to vector<16x128xf32>
    %7 = arith.addf %3, %6 : vector<16x128xf32>
    %cst_6 = arith.constant dense<0.000000e+00> : vector<16xf32>
    %8 = vector.multi_reduction <add>, %7, %cst_6 [1] : vector<16x128xf32> to vector<16xf32>
    %9 = vector.shape_cast %8 : vector<16xf32> to vector<16x1xf32>
    %cst_7 = arith.constant 1.280000e+02 : f32
    %10 = vector.broadcast %cst_7 : f32 to vector<16x1xf32>
    %11 = arith.divf %9, %10 : vector<16x1xf32>
    %12 = vector.broadcast %11 : vector<16x1xf32> to vector<16x128xf32>
    %13 = arith.subf %7, %12 : vector<16x128xf32>
    %14 = arith.mulf %13, %13 : vector<16x128xf32>
    %cst_8 = arith.constant dense<0.000000e+00> : vector<16xf32>
    %15 = vector.multi_reduction <add>, %14, %cst_8 [1] : vector<16x128xf32> to vector<16xf32>
    %16 = vector.shape_cast %15 : vector<16xf32> to vector<16x1xf32>
    %cst_9 = arith.constant 1.280000e+02 : f32
    %17 = vector.broadcast %cst_9 : f32 to vector<16x1xf32>
    %18 = arith.divf %16, %17 : vector<16x1xf32>
    %cst_10 = arith.constant 9.99999997E-7 : f32
    %19 = vector.broadcast %cst_10 : f32 to vector<16x1xf32>
    %20 = arith.addf %18, %19 : vector<16x1xf32>
    %21 = math.rsqrt %20 : vector<16x1xf32>
    %22 = vector.broadcast %21 : vector<16x1xf32> to vector<16x128xf32>
    %23 = arith.mulf %13, %22 : vector<16x128xf32>
    %24 = vector.extract_strided_slice %4 {offsets = [1, 0], sizes = [1, 128], strides = [1, 1]} : vector<3x128xf32> to vector<1x128xf32>
    %25 = vector.broadcast %24 : vector<1x128xf32> to vector<16x128xf32>
    %26 = arith.mulf %23, %25 : vector<16x128xf32>
    %27 = vector.extract_strided_slice %4 {offsets = [2, 0], sizes = [1, 128], strides = [1, 1]} : vector<3x128xf32> to vector<1x128xf32>
    %28 = vector.broadcast %27 : vector<1x128xf32> to vector<16x128xf32>
    %29 = arith.addf %26, %28 : vector<16x128xf32>
    %cst_11 = arith.constant 5.000000e-01 : f32
    %30 = vector.broadcast %cst_11 : f32 to vector<16x128xf32>
    %31 = arith.mulf %30, %29 : vector<16x128xf32>
    %32 = arith.mulf %29, %29 : vector<16x128xf32>
    %33 = arith.mulf %32, %29 : vector<16x128xf32>
    %cst_12 = arith.constant 4.471500e-02 : f32
    %34 = vector.broadcast %cst_12 : f32 to vector<16x128xf32>
    %35 = arith.mulf %34, %33 : vector<16x128xf32>
    %36 = arith.addf %29, %35 : vector<16x128xf32>
    %cst_13 = arith.constant 0.797884583 : f32
    %37 = vector.broadcast %cst_13 : f32 to vector<16x128xf32>
    %38 = arith.mulf %37, %36 : vector<16x128xf32>
    %39 = math.tanh %38 : vector<16x128xf32>
    %cst_14 = arith.constant 1.000000e+00 : f32
    %40 = vector.broadcast %cst_14 : f32 to vector<16x128xf32>
    %41 = arith.addf %40, %39 : vector<16x128xf32>
    %42 = arith.mulf %31, %41 : vector<16x128xf32>
    %c0_15 = arith.constant 0 : index
    %c0_16 = arith.constant 0 : index
    %c0_17 = arith.constant 0 : index
    %43 = vector.load %arg5[%c0_15, %c0_16, %c0_17] : memref<1x16x128xf32, #tpu.memory_space<vmem>>, vector<1x16x128xf32>
    %44 = vector.shape_cast %43 : vector<1x16x128xf32> to vector<16x128xf32>
    %45 = vector.shape_cast %42 : vector<16x128xf32> to vector<1x16x128xf32>
    tpu.vector_store %arg5[%c0_15, %c0_16, %c0_17], %45 {strides = array<i32>} : memref<1x16x128xf32, #tpu.memory_space<vmem>>, vector<1x16x128xf32>,
    return
  }
  func.func @transform_0(%arg0: i32, %arg1: i32) -> (i32, i32, i32) {
    %c0_i32 = arith.constant 0 : i32
    %c0_i32_0 = arith.constant 0 : i32
    return %arg0, %c0_i32, %arg1 : i32, i32, i32
  }
  func.func @transform_1(%arg0: i32, %arg1: i32) -> (i32, i32) {
    %c0_i32 = arith.constant 0 : i32
    %c0_i32_0 = arith.constant 0 : i32
    %c0_i32_1 = arith.constant 0 : i32
    return %c0_i32, %c0_i32_0 : i32, i32
  }
  func.func @transform_2(%arg0: i32, %arg1: i32) -> (i32, i32) {
    %c0_i32 = arith.constant 0 : i32
    %c0_i32_0 = arith.constant 0 : i32
    %c0_i32_1 = arith.constant 0 : i32
    return %c0_i32, %c0_i32_0 : i32, i32
  }
  func.func @transform_3(%arg0: i32, %arg1: i32) -> (i32, i32, i32) {
    %c0_i32 = arith.constant 0 : i32
    %c0_i32_0 = arith.constant 0 : i32
    return %arg0, %arg1, %c0_i32 : i32, i32, i32
  }
}

</mosaic_0001>

<bundles_post_ra>
// kernel: fcu_down_forward.1
= control target key start
LH: loop header
LB: loop body
LE: loop exit
PB: predicated region body
PF: predicated region fallthrough
CT: control target
= control target key end

     0   :  { %s560_s12 = smov 0   ;;  %s562_s13 = smov 0   ;;  %s603_s0 = inlined_call_operand.vmem [shape: f32[2,8,16], index: 0, kind: input, shape index: {}]   ;;  %s604_s1 = inlined_call_operand.vmem [shape: f32[8,128], index: 1, kind: input, shape index: {}]   ;;  %s605_s2 = inlined_call_operand.vmem [shape: f32[3,128], index: 2, kind: input, shape index: {}]   ;;  %s606_s3 = inlined_call_operand.vmem [shape: f32[2,16,128], index: 3, kind: output, shape index: {}]  }
   0x1   :  { %s564_s14 = smov 0  }
   0x2 LB: > { %s25_s15 = sadd.s32 1, %s534_s13  ;;  %p466_p0 = scmp.ge.s32.totalorder %s538_s14, 1  ;;  %s538_s14 = sphi %s564_s14, %s13_s14   ;;  %s534_s13 = sphi %s562_s13, %s608_s13   ;;  %s530_s12 = sphi %s560_s12, %s607_s12  }
   0x3   : > { %p27_p1 = scmp.ge.s32.totalorder %s25_s15, 2  ;;  %p155_p2 = scmp.lt.s32.totalorder %s538_s14, 3 }
   0x5   : > { %s610_s15 = smov (%p27_p1, %s25_s15), 0  ;;  %p156_p3 = pnand %p466_p0, %p155_p2 }
   0x6   : > { %p185_p4 = scmp.lt.s32.totalorder (!%p156_p3), %s530_s12, 1 }
   0x7   : > { %159 = sbr.rel (%p156_p3) target bundleno = 681 (0x2a9), region = 32 }
   0xc   : > { %s612_s12 = smov (!%p185_p4, %s530_s12), 1  ;;  %v203_v0 = vld [vmem:[%s604_s1] sm:$0xff]  ;;  %vm241_vm0 = vcmask 64512   ;;  %v205_v4 = vlaneseq }
   0xd   : > { %s467_s16 = sshll.u32 %s612_s12, 3  ;;  %478 = vmatprep.subr.mxu0 %v203_v0  ;;  %v204_v7 = vld [vmem:[%s605_s2] sm:$0x7]  ;;  %s474_s24 = sshll.u32 %s612_s12, 4 }
   0xe   : > { %s191_s21 = scalar_lea.vmem %s603_s0, %s467_s16  ;;  %479 = vmatpush3.msra.mxu0 %v203_v0  ;;  %v206_v5 = vshrl.u32 %v205_v4, 7  ;;  %s200_s27 = scalar_lea.vmem %s606_s3, %s474_s24 }
   0xf   : > { %v202_v1 = vld [vmem:[%s191_s21] sm:$0xff] }
  0x10   : > { %209 = vxpose.xlu0.b32.start.end [1/1] (short) (narrow) %v202_v1, 16  ;;  %v207_v6 = vsub.s32 0, %v206_v5  ;;  %v348_v27 = vsub.s32 1, %v206_v5  ;;  %v354_v28 = vsub.s32 2, %v206_v5 }
  0x12   : > { %v208_v8 = vrot.slane %v204_v7, %v207_v6  ;;  %v349_v29 = vrot.slane %v204_v7, %v348_v27  ;;  %v355_v31 = vrot.slane %v204_v7, %v354_v28 }
  0x8c   : > { %v225_v2 = vpop.trf.xlu0 }
  0x8d   : > { %480 = vmatprep.mubr.msk.f32.mxu0 %vm241_vm0, %v225_v2 }
  0x90   : > { %v226_v3 = vpop.trf.xlu0 }
  0x91   : > { %481 = vmatmul.mubr.msk.f32.vlgmr.msra.gmra.mxu0 %vm241_vm0, %v226_v3 }
 0x151   : > { %v482_v9 = vpop.f32.mrf.mxu0 }
 0x152   : > { %v320_v10 = vadd.f32 %v482_v9, %v208_v8 }
 0x153   : > { %v314_v11 = vpop.f32.mrf.mxu0 }
 0x154   : > { %v315_v12 = vadd.f32 %v314_v11, %v208_v8  ;;  %325 = vadd.xlane.f32.xlu1 %v320_v10 }
 0x156   : > { %323 = vadd.xlane.f32.xlu0 %v315_v12 }
 0x1dd   : > { %v326_v13 = vpop.xlane.xlu1 %325 }
 0x1de   : > { %v329_v15 = vmul.f32 0.0078125, %v326_v13 }
 0x1df   : > { %v324_v14 = vpop.xlane.xlu0 %323 }
 0x1e0   : > { %v328_v16 = vmul.f32 0.0078125, %v324_v14  ;;  %v331_v18 = vsub.f32 %v320_v10, %v329_v15 }
 0x1e2   : > { %v330_v17 = vsub.f32 %v315_v12, %v328_v16  ;;  %v333_v20 = vmul.f32 %v331_v18, %v331_v18 }
 0x1e4   : > { %v332_v19 = vmul.f32 %v330_v17, %v330_v17 }
 0x1e6   : > { %334 = vadd.xlane.f32.xlu1 %v332_v19 }
 0x1ea   : > { %336 = vadd.xlane.f32.xlu1 %v333_v20 }
 0x26f   : > { %v335_v21 = vpop.xlane.xlu1 %334 }
 0x270   : > { %v338_v22 = vmul.f32 0.0078125, %v335_v21 }
 0x272   : > { %v340_v23 = vadd.f32 1e-06, %v338_v22 }
 0x273   : > { %v337_v24 = vpop.xlane.xlu1 %336 }
 0x274   : > { %508 = vrsqrt.f32 %v340_v23  ;;  %v339_v25 = vmul.f32 0.0078125, %v337_v24 }
 0x276   : > { %v341_v26 = vadd.f32 1e-06, %v339_v25 }
 0x278   : > { %510 = vrsqrt.f32 %v341_v26 }
 0x281   : > { %v509_v30 = vpop.eup %508 }
 0x282   : > { %v344_v32 = vmul.f32 %v509_v30, %v330_v17 }
 0x284   : > { %v350_v33 = vmul.f32 %v349_v29, %v344_v32 }
 0x285   : > { %v511_v34 = vpop.eup %510 }
 0x286   : > { %v356_v35 = vadd.f32 %v355_v31, %v350_v33  ;;  %v345_v36 = vmul.f32 %v511_v34, %v331_v18 }
 0x288   : > { %v360_v37 = vmul.f32 %v356_v35, %v356_v35  ;;  %v351_v38 = vmul.f32 %v349_v29, %v345_v36  ;;  %v358_v50 = vmul.f32 0.5, %v356_v35 }
 0x28a   : > { %v362_v39 = vmul.f32 %v360_v37, %v356_v35  ;;  %v357_v40 = vadd.f32 %v355_v31, %v351_v38 }
 0x28c   : > { %v364_v41 = vmul.f32 0.044715, %v362_v39  ;;  %v361_v42 = vmul.f32 %v357_v40, %v357_v40  ;;  %v359_v54 = vmul.f32 0.5, %v357_v40 }
 0x28e   : > { %v366_v43 = vadd.f32 %v364_v41, %v356_v35  ;;  %v363_v44 = vmul.f32 %v361_v42, %v357_v40 }
 0x290   : > { %v368_v45 = vmul.f32 0.7978846, %v366_v43  ;;  %v365_v46 = vmul.f32 0.044715, %v363_v44 }
 0x292   : > { %512 = vtanh.f32 %v368_v45  ;;  %v367_v47 = vadd.f32 %v365_v46, %v357_v40 }
 0x294   : > { %v369_v48 = vmul.f32 0.7978846, %v367_v47 }
 0x296   : > { %514 = vtanh.f32 %v369_v48 }
 0x29f   : > { %v513_v49 = vpop.eup %512 }
 0x2a0   : > { %v372_v51 = vadd.f32 1.0, %v513_v49 }
 0x2a2   : > { %v374_v52 = vmul.f32 %v372_v51, %v358_v50 }
 0x2a3   : > { %v515_v53 = vpop.eup %514 }
 0x2a4   : > { %376 = vst [vmem:[%s200_s27] sm:$0xff] %v374_v52  ;;  %v373_v55 = vadd.f32 1.0, %v515_v53 }
 0x2a6   : > { %v375_v56 = vmul.f32 %v373_v55, %v359_v54 }
 0x2a8   : > { %377 = vst [vmem:[%s200_s27 + $0x8] sm:$0xff] %v375_v56 }
 0x2a9 PF: > { %s13_s14 = sadd.s32 1, %s538_s14   ;;  %s607_s12 = smov %s534_s13 }
 0x2aa   : > { %p10_p5 = scmp.ge.s32.totalorder %s13_s14, 4   ;;  %s608_s13 = smov %s610_s15 }
 0x2ac   :  { %12 = sbr.rel (!%p10_p5) target bundleno = 2 (0x2), region = 62 }

</bundles_post_ra>
